<compile_context>
chip_gen: v7x
topology: tpu7x:2x2x1
jax: 0.10.0
libtpu: 0.0.40
codegen_flags: <defaults>
</compile_context>

<pallas_src>
import jax
import jax.numpy as jnp
from jax import lax
from jax.experimental import pallas as pl
from jax.experimental.pallas import tpu as pltpu


def _round_up(x, m):
    return ((x + m - 1) // m) * m


def _lr_conv_kernel(p_ref, wl_ref, wr_ref, o_ref):
    """One (batch, time-tile) step.

    p_ref : (s, TT + H, c)   phase-decomposed, halo-augmented input slab
             p_ref[r, j, :] == padded_x[(tile_start + j) * s + r, :]
    wl_ref: (k, c, c)        left  conv weights, (tap, c_in, c_out)
    wr_ref: (k, c, c)        right conv weights, (tap, c_in, c_out)
    o_ref : (TT, 2*c)        output tile, channels-last
    """
    s = p_ref.shape[0]
    c = p_ref.shape[2]
    k = wl_ref.shape[0]
    tt = o_ref.shape[0]

    acc_l = jnp.zeros((tt, c), jnp.float32)
    acc_r = jnp.zeros((tt, c), jnp.float32)

    # Left conv uses padded-sequence taps 0 .. k-1.
    for tap in range(k):
        q, r = divmod(tap, s)                      # static ints -> static slices
        x_tap = p_ref[r, q:q + tt, :]              # (TT, c)
        acc_l = acc_l + jnp.dot(x_tap, wl_ref[tap],
                                preferred_element_type=jnp.float32)

    # Right conv uses padded-sequence taps k+1 .. 2k.
    for j in range(k):
        q, r = divmod(k + 1 + j, s)
        x_tap = p_ref[r, q:q + tt, :]
        acc_r = acc_r + jnp.dot(x_tap, wr_ref[j],
                                preferred_element_type=jnp.float32)

    # Disjoint-slice writes instead of a lane concatenate.
    o_ref[:, :c] = acc_l.astype(o_ref.dtype)
    o_ref[:, c:] = acc_r.astype(o_ref.dtype)


def left_right_feature_extractor(x, w_left, w_right, *, stride, kernel_size,
                                 block_t_out=512, compute_dtype=None):
    """x: (b, c, t); conv weights: (c, c, kernel_size). Returns (b, t_out, 2*c)."""
    b, c, t = x.shape
    k, s = kernel_size, stride

    # Output length matches Conv1d(VALID) on the (t + k - 1)-long shifted pads.
    t_out = (t - 1) // s + 1

    # --- tiling over output time positions -----------------------------------
    tt = min(_round_up(block_t_out, 8), _round_up(t_out, 8))   # tile of output rows
    n_tiles = pl.cdiv(t_out, tt)
    halo = (2 * k) // s                                        # extra phase rows per tile
    t_phase = n_tiles * tt + halo                              # phase-space length
    pad_len = t_phase * s                                      # full padded sequence length

    # --- build the replicate-padded sequence once (channels-last) ------------
    xc = jnp.transpose(x, (0, 2, 1))                           # (b, t, c)
    front = jnp.repeat(xc[:, :1, :], k, axis=1)                # k edge-replicated rows
    back = jnp.repeat(xc[:, -1:, :], pad_len - t - k, axis=1)  # edge pad to pad_len
    p = jnp.concatenate([front, xc, back], axis=1)             # (b, pad_len, c)

    # Phase decomposition: p_ph[b, r, j, :] = p[b, j*s + r, :]  (stride handled here,
    # so all in-kernel slices are contiguous).
    p_ph = p.reshape(b, t_phase, s, c).transpose(0, 2, 1, 3)   # (b, s, t_phase, c)

    # Halo-augmented tiles: duplicates only `halo` rows per tile (tiny).
    p_tiles = jnp.stack(
        [p_ph[:, :, i * tt:i * tt + tt + halo, :] for i in range(n_tiles)],
        axis=1)                                                # (b, n_tiles, s, tt+halo, c)

    # Weights -> (tap, c_in, c_out).  Hoist this out of any training loop in real use.
    wl = jnp.transpose(w_left, (2, 1, 0))
    wr = jnp.transpose(w_right, (2, 1, 0))

    if compute_dtype is not None:                              # e.g. bf16 on v6e/v7x
        p_tiles = p_tiles.astype(compute_dtype)
        wl = wl.astype(compute_dtype)
        wr = wr.astype(compute_dtype)

    out_dtype = x.dtype
    in_bytes = (p_tiles.size * p_tiles.dtype.itemsize
                + 2 * wl.size * wl.dtype.itemsize)
    out_bytes = b * n_tiles * tt * 2 * c * jnp.dtype(out_dtype).itemsize
    cost = pl.CostEstimate(flops=2 * b * n_tiles * tt * c * c * (2 * k),
                           transcendentals=0,
                           bytes_accessed=in_bytes + out_bytes)

    out = pl.pallas_call(
        _lr_conv_kernel,
        out_shape=jax.ShapeDtypeStruct((b, n_tiles, tt, 2 * c), out_dtype),
        grid_spec=pl.GridSpec(
            grid=(b, n_tiles),
            in_specs=[
                # (1, 1, s, tt+halo, c) block, batch/tile dims squeezed away.
                pl.BlockSpec((None, None, s, tt + halo, c),
                             lambda bi, ti: (bi, ti, 0, 0, 0)),
                # Weights resident across the whole grid.
                pl.BlockSpec((k, c, c), lambda bi, ti: (0, 0, 0)),
                pl.BlockSpec((k, c, c), lambda bi, ti: (0, 0, 0)),
            ],
            out_specs=pl.BlockSpec((None, None, tt, 2 * c),
                                   lambda bi, ti: (bi, ti, 0, 0)),
        ),
        compiler_params=pltpu.CompilerParams(
            dimension_semantics=("parallel", "parallel")),
        cost_estimate=cost,
    )(p_tiles, wl, wr)

    # (b, n_tiles, tt, 2c) -> (b, n_tiles*tt, 2c) is a free contiguous reshape; drop
    # the padded tail rows.
    return out.reshape(b, n_tiles * tt, 2 * c)[:, :t_out, :]


def _reference(x, w_left, w_right, *, stride, kernel_size):
    """Pure-JAX reference using lax.conv_general_dilated (independent of the kernel path)."""
    k = kernel_size
    left_pad = jnp.concatenate([jnp.repeat(x[:, :, :1], k, axis=2), x], axis=2)[:, :, :-1]
    right_pad = jnp.concatenate([x, jnp.repeat(x[:, :, -1:], k, axis=2)], axis=2)[:, :, 1:]
    dn = lax.conv_dimension_numbers(left_pad.shape, w_left.shape, ('NCH', 'OIH', 'NCH'))
    lf = lax.conv_general_dilated(left_pad, w_left, (stride,), 'VALID', dimension_numbers=dn)
    rf = lax.conv_general_dilated(right_pad, w_right, (stride,), 'VALID', dimension_numbers=dn)
    feats = jnp.concatenate([lf, rf], axis=1)       # (b, 2c, t_out)
    return jnp.transpose(feats, (0, 2, 1))          # (b, t_out, 2c)


if __name__ == "__main__":
    # Small shapes consistent with the module: x = (b, dim, t)
    b, dim, t = 2, 8, 16
    kernel_size, stride = 3, 2

    key = jax.random.PRNGKey(0)
    kx, kl, kr = jax.random.split(key, 3)
    x = jax.random.normal(kx, (b, dim, t), dtype=jnp.float32)
    # Deterministic synthetic Conv1d weights, shape (out=dim, in=dim, kernel_size), no bias.
    w_left = jax.random.normal(kl, (dim, dim, kernel_size), dtype=jnp.float32) * 0.1
    w_right = jax.random.normal(kr, (dim, dim, kernel_size), dtype=jnp.float32) * 0.1

    ref = _reference(x, w_left, w_right, stride=stride, kernel_size=kernel_size)

    # f32 path (tight tolerance).
    out = left_right_feature_extractor(x, w_left, w_right,
                                       stride=stride, kernel_size=kernel_size)
    out = jax.block_until_ready(out)
    assert out.shape == ref.shape, (out.shape, ref.shape)
    assert jnp.allclose(out, ref, atol=2e-4, rtol=2e-4), float(jnp.max(jnp.abs(out - ref)))

    # bf16 operands / f32 accumulation path (looser tolerance).
    out_bf16 = left_right_feature_extractor(x, w_left, w_right,
                                            stride=stride, kernel_size=kernel_size,
                                            compute_dtype=jnp.bfloat16)
    out_bf16 = jax.block_until_ready(out_bf16)
    assert out_bf16.shape == ref.shape, (out_bf16.shape, ref.shape)
    assert jnp.allclose(out_bf16, ref, atol=6e-2, rtol=6e-2), \
        float(jnp.max(jnp.abs(out_bf16 - ref)))

    print("KERNEL_OK")
</pallas_src>

<mosaic_0001>
module attributes {stable_mosaic.version = 11 : i64} {
  func.func @_lr_conv_kernel(%arg0: i32, %arg1: i32, %arg2: memref<1x1x2x11x8xf32, #tpu.memory_space<vmem>>, %arg3: memref<3x8x8xf32, #tpu.memory_space<vmem>>, %arg4: memref<3x8x8xf32, #tpu.memory_space<vmem>>, %arg5: memref<1x1x8x16xf32, #tpu.memory_space<vmem>>) attributes {dimension_semantics = [#tpu.dimension_semantics<parallel>, #tpu.dimension_semantics<parallel>], iteration_bounds = array<i64: 2, 1>, scalar_prefetch = 0 : i64, scratch_operands = 0 : i64, tpu.core_type = #tpu.core_type<tc>, window_params = [{transform_indices = @transform_0, window_bounds = array<i64: 1, 1, 2, 11, 8>}, {pipeline_mode = #tpu.pipeline_mode<synchronous>, transform_indices = @transform_1, window_bounds = array<i64: 3, 8, 8>}, {pipeline_mode = #tpu.pipeline_mode<synchronous>, transform_indices = @transform_2, window_bounds = array<i64: 3, 8, 8>}, {transform_indices = @transform_3, window_bounds = array<i64: 1, 1, 8, 16>}]} {
    %cst = arith.constant 0.000000e+00 : f32
    %0 = vector.broadcast %cst : f32 to vector<8x8xf32>
    %cst_0 = arith.constant 0.000000e+00 : f32
    %1 = vector.broadcast %cst_0 : f32 to vector<8x8xf32>
    %c0 = arith.constant 0 : index
    %c0_1 = arith.constant 0 : index
    %c0_2 = arith.constant 0 : index
    %c0_3 = arith.constant 0 : index
    %c0_4 = arith.constant 0 : index
    %2 = vector.load %arg2[%c0, %c0_1, %c0_2, %c0_3, %c0_4] : memref<1x1x2x11x8xf32, #tpu.memory_space<vmem>>, vector<1x1x1x8x8xf32>
    %3 = vector.shape_cast %2 : vector<1x1x1x8x8xf32> to vector<8x8xf32>
    %c0_5 = arith.constant 0 : index
    %c0_6 = arith.constant 0 : index
    %c0_7 = arith.constant 0 : index
    %4 = vector.load %arg3[%c0_5, %c0_6, %c0_7] : memref<3x8x8xf32, #tpu.memory_space<vmem>>, vector<1x8x8xf32>
    %5 = vector.shape_cast %4 : vector<1x8x8xf32> to vector<8x8xf32>
    %cst_8 = arith.constant dense<0.000000e+00> : vector<8x8xf32>
    %6 = tpu.matmul %3, %5, %cst_8 {dimension_numbers = #tpu.dot_dimension_numbers<[1], [0], [0], [1], [0, 0, 1, 1], [], []>} : vector<8x8xf32>, vector<8x8xf32>, vector<8x8xf32> -> vector<8x8xf32>
    %7 = arith.addf %0, %6 : vector<8x8xf32>
    %c0_9 = arith.constant 0 : index
    %c0_10 = arith.constant 0 : index
    %c1 = arith.constant 1 : index
    %c0_11 = arith.constant 0 : index
    %c0_12 = arith.constant 0 : index
    %8 = vector.load %arg2[%c0_9, %c0_10, %c1, %c0_11, %c0_12] : memref<1x1x2x11x8xf32, #tpu.memory_space<vmem>>, vector<1x1x1x8x8xf32>
    %9 = vector.shape_cast %8 : vector<1x1x1x8x8xf32> to vector<8x8xf32>
    %c1_13 = arith.constant 1 : index
    %c0_14 = arith.constant 0 : index
    %c0_15 = arith.constant 0 : index
    %10 = vector.load %arg3[%c1_13, %c0_14, %c0_15] : memref<3x8x8xf32, #tpu.memory_space<vmem>>, vector<1x8x8xf32>
    %11 = vector.shape_cast %10 : vector<1x8x8xf32> to vector<8x8xf32>
    %cst_16 = arith.constant dense<0.000000e+00> : vector<8x8xf32>
    %12 = tpu.matmul %9, %11, %cst_16 {dimension_numbers = #tpu.dot_dimension_numbers<[1], [0], [0], [1], [0, 0, 1, 1], [], []>} : vector<8x8xf32>, vector<8x8xf32>, vector<8x8xf32> -> vector<8x8xf32>
    %13 = arith.addf %7, %12 : vector<8x8xf32>
    %c0_17 = arith.constant 0 : index
    %c0_18 = arith.constant 0 : index
    %c0_19 = arith.constant 0 : index
    %c1_20 = arith.constant 1 : index
    %c0_21 = arith.constant 0 : index
    %14 = vector.load %arg2[%c0_17, %c0_18, %c0_19, %c1_20, %c0_21] : memref<1x1x2x11x8xf32, #tpu.memory_space<vmem>>, vector<1x1x1x8x8xf32>
    %15 = vector.shape_cast %14 : vector<1x1x1x8x8xf32> to vector<8x8xf32>
    %c2 = arith.constant 2 : index
    %c0_22 = arith.constant 0 : index
    %c0_23 = arith.constant 0 : index
    %16 = vector.load %arg3[%c2, %c0_22, %c0_23] : memref<3x8x8xf32, #tpu.memory_space<vmem>>, vector<1x8x8xf32>
    %17 = vector.shape_cast %16 : vector<1x8x8xf32> to vector<8x8xf32>
    %cst_24 = arith.constant dense<0.000000e+00> : vector<8x8xf32>
    %18 = tpu.matmul %15, %17, %cst_24 {dimension_numbers = #tpu.dot_dimension_numbers<[1], [0], [0], [1], [0, 0, 1, 1], [], []>} : vector<8x8xf32>, vector<8x8xf32>, vector<8x8xf32> -> vector<8x8xf32>
    %19 = arith.addf %13, %18 : vector<8x8xf32>
    %c0_25 = arith.constant 0 : index
    %c0_26 = arith.constant 0 : index
    %c0_27 = arith.constant 0 : index
    %c2_28 = arith.constant 2 : index
    %c0_29 = arith.constant 0 : index
    %20 = vector.load %arg2[%c0_25, %c0_26, %c0_27, %c2_28, %c0_29] : memref<1x1x2x11x8xf32, #tpu.memory_space<vmem>>, vector<1x1x1x8x8xf32>
    %21 = vector.shape_cast %20 : vector<1x1x1x8x8xf32> to vector<8x8xf32>
    %c0_30 = arith.constant 0 : index
    %c0_31 = arith.constant 0 : index
    %c0_32 = arith.constant 0 : index
    %22 = vector.load %arg4[%c0_30, %c0_31, %c0_32] : memref<3x8x8xf32, #tpu.memory_space<vmem>>, vector<1x8x8xf32>
    %23 = vector.shape_cast %22 : vector<1x8x8xf32> to vector<8x8xf32>
    %cst_33 = arith.constant dense<0.000000e+00> : vector<8x8xf32>
    %24 = tpu.matmul %21, %23, %cst_33 {dimension_numbers = #tpu.dot_dimension_numbers<[1], [0], [0], [1], [0, 0, 1, 1], [], []>} : vector<8x8xf32>, vector<8x8xf32>, vector<8x8xf32> -> vector<8x8xf32>
    %25 = arith.addf %1, %24 : vector<8x8xf32>
    %c0_34 = arith.constant 0 : index
    %c0_35 = arith.constant 0 : index
    %c1_36 = arith.constant 1 : index
    %c2_37 = arith.constant 2 : index
    %c0_38 = arith.constant 0 : index
    %26 = vector.load %arg2[%c0_34, %c0_35, %c1_36, %c2_37, %c0_38] : memref<1x1x2x11x8xf32, #tpu.memory_space<vmem>>, vector<1x1x1x8x8xf32>
    %27 = vector.shape_cast %26 : vector<1x1x1x8x8xf32> to vector<8x8xf32>
    %c1_39 = arith.constant 1 : index
    %c0_40 = arith.constant 0 : index
    %c0_41 = arith.constant 0 : index
    %28 = vector.load %arg4[%c1_39, %c0_40, %c0_41] : memref<3x8x8xf32, #tpu.memory_space<vmem>>, vector<1x8x8xf32>
    %29 = vector.shape_cast %28 : vector<1x8x8xf32> to vector<8x8xf32>
    %cst_42 = arith.constant dense<0.000000e+00> : vector<8x8xf32>
    %30 = tpu.matmul %27, %29, %cst_42 {dimension_numbers = #tpu.dot_dimension_numbers<[1], [0], [0], [1], [0, 0, 1, 1], [], []>} : vector<8x8xf32>, vector<8x8xf32>, vector<8x8xf32> -> vector<8x8xf32>
    %31 = arith.addf %25, %30 : vector<8x8xf32>
    %c0_43 = arith.constant 0 : index
    %c0_44 = arith.constant 0 : index
    %c0_45 = arith.constant 0 : index
    %c3 = arith.constant 3 : index
    %c0_46 = arith.constant 0 : index
    %32 = vector.load %arg2[%c0_43, %c0_44, %c0_45, %c3, %c0_46] : memref<1x1x2x11x8xf32, #tpu.memory_space<vmem>>, vector<1x1x1x8x8xf32>
    %33 = vector.shape_cast %32 : vector<1x1x1x8x8xf32> to vector<8x8xf32>
    %c2_47 = arith.constant 2 : index
    %c0_48 = arith.constant 0 : index
    %c0_49 = arith.constant 0 : index
    %34 = vector.load %arg4[%c2_47, %c0_48, %c0_49] : memref<3x8x8xf32, #tpu.memory_space<vmem>>, vector<1x8x8xf32>
    %35 = vector.shape_cast %34 : vector<1x8x8xf32> to vector<8x8xf32>
    %cst_50 = arith.constant dense<0.000000e+00> : vector<8x8xf32>
    %36 = tpu.matmul %33, %35, %cst_50 {dimension_numbers = #tpu.dot_dimension_numbers<[1], [0], [0], [1], [0, 0, 1, 1], [], []>} : vector<8x8xf32>, vector<8x8xf32>, vector<8x8xf32> -> vector<8x8xf32>
    %37 = arith.addf %31, %36 : vector<8x8xf32>
    %c0_51 = arith.constant 0 : index
    %c0_52 = arith.constant 0 : index
    %c0_53 = arith.constant 0 : index
    %c0_54 = arith.constant 0 : index
    %38 = vector.load %arg5[%c0_51, %c0_52, %c0_53, %c0_54] : memref<1x1x8x16xf32, #tpu.memory_space<vmem>>, vector<1x1x8x8xf32>
    %39 = vector.shape_cast %38 : vector<1x1x8x8xf32> to vector<8x8xf32>
    %40 = vector.shape_cast %19 : vector<8x8xf32> to vector<1x1x8x8xf32>
    tpu.vector_store %arg5[%c0_51, %c0_52, %c0_53, %c0_54], %40 {strides = array<i32>} : memref<1x1x8x16xf32, #tpu.memory_space<vmem>>, vector<1x1x8x8xf32>,
    %c0_55 = arith.constant 0 : index
    %c0_56 = arith.constant 0 : index
    %c0_57 = arith.constant 0 : index
    %c8 = arith.constant 8 : index
    %41 = vector.load %arg5[%c0_55, %c0_56, %c0_57, %c8] : memref<1x1x8x16xf32, #tpu.memory_space<vmem>>, vector<1x1x8x8xf32>
    %42 = vector.shape_cast %41 : vector<1x1x8x8xf32> to vector<8x8xf32>
    %43 = vector.shape_cast %37 : vector<8x8xf32> to vector<1x1x8x8xf32>
    tpu.vector_store %arg5[%c0_55, %c0_56, %c0_57, %c8], %43 {strides = array<i32>} : memref<1x1x8x16xf32, #tpu.memory_space<vmem>>, vector<1x1x8x8xf32>,
    return
  }
  func.func @transform_0(%arg0: i32, %arg1: i32) -> (i32, i32, i32, i32, i32) {
    %c0_i32 = arith.constant 0 : i32
    %c0_i32_0 = arith.constant 0 : i32
    %c0_i32_1 = arith.constant 0 : i32
    %c0_i32_2 = arith.constant 0 : i32
    return %arg0, %arg1, %c0_i32, %c0_i32_0, %c0_i32_1 : i32, i32, i32, i32, i32
  }
  func.func @transform_1(%arg0: i32, %arg1: i32) -> (i32, i32, i32) {
    %c0_i32 = arith.constant 0 : i32
    %c0_i32_0 = arith.constant 0 : i32
    %c0_i32_1 = arith.constant 0 : i32
    %c0_i32_2 = arith.constant 0 : i32
    return %c0_i32, %c0_i32_0, %c0_i32_1 : i32, i32, i32
  }
  func.func @transform_2(%arg0: i32, %arg1: i32) -> (i32, i32, i32) {
    %c0_i32 = arith.constant 0 : i32
    %c0_i32_0 = arith.constant 0 : i32
    %c0_i32_1 = arith.constant 0 : i32
    %c0_i32_2 = arith.constant 0 : i32
    return %c0_i32, %c0_i32_0, %c0_i32_1 : i32, i32, i32
  }
  func.func @transform_3(%arg0: i32, %arg1: i32) -> (i32, i32, i32, i32) {
    %c0_i32 = arith.constant 0 : i32
    %c0_i32_0 = arith.constant 0 : i32
    %c0_i32_1 = arith.constant 0 : i32
    return %arg0, %arg1, %c0_i32, %c0_i32_0 : i32, i32, i32, i32
  }
}

</mosaic_0001>

<bundles_post_ra>
// kernel: tpu_custom_call.1
= control target key start
LH: loop header
LB: loop body
LE: loop exit
PB: predicated region body
PF: predicated region fallthrough
CT: control target
= control target key end

     0   :  { %8 = vsyncpa [#allocation3], 0  ;;  %s1134_s0 = inlined_call_operand.vmem [shape: f32[2,1,2,11,8], index: 0, kind: input, shape index: {}]   ;;  %s1135_s1 = inlined_call_operand.vmem [shape: f32[3,8,8], index: 1, kind: input, shape index: {}]   ;;  %s1136_s2 = inlined_call_operand.vmem [shape: f32[3,8,8], index: 2, kind: input, shape index: {}]   ;;  %s1137_s3 = inlined_call_operand.hbm [shape: f32[2,1,8,16], index: 3, kind: output, shape index: {}]  }
   0x1   :  { %10 = vsyncpa [#allocation3 + $0x1], 0  ;;  %s991_s12 = smov 0   ;;  %s993_s13 = smov 0  }
   0x2   :  { %s995_s14 = smov 0   ;;  %s997_s15 = smov 0  }
   0x3   :  { %s999_s16 = smov 0   ;;  %s1001_s17 = smov 0  }
   0x4 LB: > { %s754_s18 = sadd.s32 4294967295, %s965_s17   ;;  %s755_s19 = sadd.s32 4294967294, %s965_s17   ;;  %s965_s17 = sphi %s1001_s17, %s16_s17   ;;  %s961_s16 = sphi %s999_s16, %s1144_s16   ;;  %s957_s15 = sphi %s997_s15, %s1143_s15   ;;  %s953_s14 = sphi %s995_s14, %s1142_s14   ;;  %s949_s13 = sphi %s993_s13, %s1141_s13   ;;  %s945_s12 = sphi %s991_s12, %s1140_s12  }
   0x5   : > { %s28_s20 = sadd.s32 1, %s961_s16  ;;  %s107_s21 = sadd.s32 1, %s953_s14 }
   0x6   : > { %p30_p0 = scmp.ge.s32.totalorder %s28_s20, 2  ;;  %p117_p1 = scmp.ne.s32.totalorder %s953_s14, %s949_s13 }
   0x7   : > { %p118_p2 = scmp.eq.s32.totalorder %s754_s18, 1  ;;  %p123_p3 = scmp.ne.s32.totalorder %s949_s13, %s945_s12 }
   0x8   : > { %s1146_s20 = smov (%p30_p0, %s28_s20), 0  ;;  %p124_p5 = scmp.eq.s32.totalorder %s755_s19, 1 }
   0x9   : > { %p1031_p4 = por %p118_p2, %p117_p1  ;;  %s102_s23 = ssub.s32 %s961_s16, %s1146_s20 }
   0xa   : > { %p758_p6 = scmp.ge.s32.totalorder %s965_s17, 1  ;;  %p105_p7 = scmp.eq.s32.totalorder %s102_s23, 0 }
   0xb   : > { %p1038_p8 = por %p124_p5, %p123_p3  ;;  %p160_p9 = scmp.lt.s32.totalorder %s965_s17, 3 }
   0xc   : > { %s1044_s25 = scalar_select %p105_p7, %s953_s14, %s107_s21  }
   0xd   : > { %p161_p10 = pnand %p758_p6, %p160_p9 }
   0xe   : > { %v769_v0 = vld [vmem:[%s1136_s2 + $0x8] sm:$0xff] (!%p161_p10)  ;;  %p188_p11 = scmp.lt.s32.totalorder (!%p161_p10), %s957_s15, 1  ;;  %v967_v1 = vmov (!%p161_p10), 0.0   ;;  %vm968_vm0 = vmmov (!%p161_p10), 0   ;;  %vm203_vm1 = vcmask (!%p161_p10), 64512   ;;  %v428_v3 = vld [vmem:[%s1136_s2] sm:$0xff] (!%p161_p10) }
   0xf   : > { %164 = sbr.rel (%p161_p10) target bundleno = 384 (0x180), region = 32  ;;  %806 = vmatprep.subr.mxu1 (!%p161_p10), %v967_v1  ;;  %808 = vmatprep.mubr.msk.f32.mxu1 (!%p161_p10), %vm968_vm0, %v967_v1  ;;  %v763_v2 = vld [vmem:[%s1135_s1 + $0x8] sm:$0xff] (!%p161_p10)  ;;  %v198_v6 = vld [vmem:[%s1135_s1] sm:$0xff] (!%p161_p10)  ;;  %v772_v8 = vld [vmem:[%s1136_s2 + $0x10] sm:$0xff] (!%p161_p10)  ;;  %s185_s26 = sand.u32 (!%p161_p10), 1, %s949_s13   ;;  %vm660_vm2 = vcmask (!%p161_p10), 130112  }
  0x10   : > { %807 = vmatpush3.msra.mxu1 (!%p161_p10), %v769_v0  ;;  %791 = vmatprep.subr.mxu0 (!%p161_p10), %v967_v1  ;;  %v766_v10 = vld [vmem:[%s1135_s1 + $0x10] sm:$0xff] (!%p161_p10)  ;;  %s759_s27 = sshll.u32 (!%p161_p10), %s185_s26, 3  ;;  %s969_s28 = smov (!%p161_p10), 8  }
  0x11   : > { %811 = vmatprep.subr.mxu1 (!%p161_p10), %v967_v1  ;;  %792 = vmatpush3.msra.mxu0 (!%p161_p10), %v763_v2  ;;  %s187_s29 = scalar_lea.vmem (!%p161_p10), [#allocation2], %s759_s27  ;;  %s663_s8 = scalar_lea.sflag (!%p161_p10), [#allocation3], %s185_s26 }
  0x12   : > { %793 = vmatprep.mubr.msk.f32.mxu0 (!%p161_p10), %vm968_vm0, %v967_v1  ;;  %796 = vmatprep.subr.mxu0 (!%p161_p10), %v967_v1 }
  0x16   : > { %s189_s30 = scalar_select %p188_p11, %s957_s15, 1 }
  0x18   : > { %s778_s4 = sshll.u32 %s189_s30, 5  ;;  %s775_s30 = sshll.u32 %s957_s15, 7 }
  0x19   : > { %s196_s7 = scalar_lea.vmem %s1134_s0, %s778_s4  ;;  %s677_s4 = sshll.u32 %s187_s29, 4  ;;  %s1089_s4 = int_to_ptr.vmem [resolvable:$true] %s677_s4 }
  0x1a   : > { %v768_v4 = vld [vmem:[%s196_s7 + $0x12] sm:$0xff]  ;;  %v427_v7 = vld [vmem:[%s196_s7 + $0x2] sm:$0xff]  ;;  %s887_s9 = scalar_lea.vmem %s1089_s4, 128  ;;  %s970_s15 = smov [#allocation2]  }
  0x1b   : > { %809 = vmatmul.mubr.msk.f32.vlgmr.msra.gmra.mrb[0].mxu1 %vm203_vm1, %v768_v4  ;;  %v762_v5 = vld [vmem:[%s196_s7 + $0x10] sm:$0xff]  ;;  %v197_v9 = vld [vmem:[%s196_s7] sm:$0xff]  ;;  %p888_p12 = scmp.ne.s32.totalorder %s1089_s4, %s887_s9  ;;  %s891_s10 = sshll.u32 %s970_s15, 4  ;;  %s892_s10 = int_to_ptr.vmem [resolvable:$false] %s891_s10 }
  0x1c   : > { %812 = vmatpush3.msra.mxu1 %v428_v3  ;;  %813 = vmatprep.mubr.msk.f32.mxu1 %vm968_vm0, %v967_v1  ;;  %v578_v11 = vld [vmem:[%s196_s7 + $0x3] sm:$0xff]  ;;  %s893_s11 = scalar_lea.vmem %s892_s10, 256  ;;  %p894_p1 = scmp.lt.s32.totalorder %s1089_s4, %s892_s10 }
  0x1d   : > { %816 = vmatprep.subr.mxu1 %v967_v1  ;;  %794 = vmatmul.mubr.msk.f32.vlgmr.msra.gmra.mrb[0].mxu0 %vm203_vm1, %v762_v5  ;;  %v350_v12 = vld [vmem:[%s196_s7 + $0x1] sm:$0xff]  ;;  %s1087_s7 = scalar_lea.hbm %s1137_s3, %s775_s30  ;;  %p889_p13 = pnand %p888_p12, %p1031_p4 }
  0x1e   : > { %797 = vmatpush3.msra.mxu0 %v198_v6  ;;  %798 = vmatprep.mubr.msk.f32.mxu0 %vm968_vm0, %v967_v1  ;;  %p895_p2 = scmp.lt.s32.totalorder %s893_s11, %s887_s9 }
  0x1f   : > { %801 = vmatprep.subr.mxu0 %v967_v1  ;;  %p890_p0 = pneg %p889_p13 }
  0x20   : > { %p896_p3 = por %p895_p2, %p894_p1 }
  0x22   : > { %p897_p5 = pnand %p896_p3, %p890_p0 }
  0x23   : > { %814 = vmatmul.mubr.msk.f32.vlgmr.msra.gmra.mrb[0].mxu1 %vm203_vm1, %v427_v7 }
  0x24   : > { %817 = vmatpush3.msra.mxu1 %v772_v8  ;;  %818 = vmatprep.mubr.msk.f32.mxu1 %vm968_vm0, %v967_v1 }
  0x25   : > { %799 = vmatmul.mubr.msk.f32.vlgmr.msra.gmra.mrb[0].mxu0 %vm203_vm1, %v197_v9 }
  0x26   : > { %802 = vmatpush3.msra.mxu0 %v766_v10  ;;  %803 = vmatprep.mubr.msk.f32.mxu0 %vm968_vm0, %v967_v1 }
  0x2b   : > { %819 = vmatmul.mubr.msk.f32.vlgmr.msra.gmra.mrb[0].mxu1 %vm203_vm1, %v578_v11 }
  0x2d   : > { %804 = vmatmul.mubr.msk.f32.vlgmr.msra.gmra.mrb[0].mxu0 %vm203_vm1, %v350_v12 }
  0xfe   : > { %v650_v13 = vpop.f32.mrb[0].mxu1 }
  0xff   : > { %v820_v14 = vpop.f32.mrb[1].mxu1  ;;  %657 = vrot.lane.b32.xlu0 %v650_v13, %s969_s28 }
 0x100   : > { %v422_v15 = vpop.f32.mrb[0].mxu0 }
 0x101   : > { %655 = vst.msk [vmem:[%s187_s29] sm:$0xff] %vm203_vm1, %v422_v15  ;;  %v805_v16 = vpop.f32.mrb[1].mxu0 }
 0x171   : > { %v658_v17 = vpop.permute.xlu0 %657 }
 0x172   : > { %661 = vst.msk [vmem:[%s187_s29] sm:$0xff] %vm660_vm2, %v658_v17 }
 0x173   : > { %900 = shalt.err (!%p897_p5)
}
 0x174   : > { %s901_s18 = scalar_lea.hbm %s1087_s7, 128  ;;  %s905_s23 = scalar_lea.hbm %s1137_s3, 256 }
 0x175   : > { %p902_p6 = scmp.ne.s32.totalorder %s1087_s7, %s901_s18  ;;  %p906_p10 = scmp.lt.u32.totalorder %s1087_s7, %s1137_s3 }
 0x176   : > { %p907_p11 = scmp.lt.u32.totalorder %s905_s23, %s901_s18  ;;  %p909_p13 = scmp.lt.u32.totalorder %s901_s18, %s1087_s7 }
 0x177   : > { %p903_p7 = pnand %p902_p6, %p1031_p4 }
 0x178   : > { %p908_p12 = por %p907_p11, %p906_p10 }
 0x179   : > { %p904_p9 = pneg %p903_p7 }
 0x17a   : > { %p910_p0 = por %p909_p13, %p908_p12 }
 0x17c   : > { %p911_p1 = pnand %p910_p0, %p904_p9 }
 0x17e   : > { %914 = shalt.err (!%p911_p1)
}
 0x17f   : > { %829 = dma.vmem_to_hbm [thread:$0]  (%p1031_p4), %s1089_s4, 128, %s1087_s7, %s663_s8  }
 0x180 PF: > { %p835_p2 = scmp.ge.s32.totalorder %s965_s17, 2  ;;  %s689_s28 = sand.u32 1, %s945_s12  }
 0x181   : > { %s690_s29 = scalar_lea.sflag [#allocation3], %s689_s28 }
 0x182   : > { %p832_p3 = pnand %p835_p2, %p1038_p8 }
 0x184   : > { %940 = dma.done.wait (!%p832_p3), %s690_s29, 128  }
 0x185   : > { %942 = vsyncadd (!%p832_p3), %s690_s29, 4294967168  ;;  %s16_s17 = sadd.s32 1, %s965_s17   ;;  %s1140_s12 = smov %s949_s13 }
 0x186   : > { %p13_p5 = scmp.ge.s32.totalorder %s16_s17, 4   ;;  %s1141_s13 = smov %s953_s14 }
 0x187   : > { %s1142_s14 = smov %s1044_s25  ;;  %s1143_s15 = smov %s961_s16 }
 0x188   : > { %s1144_s16 = smov %s1146_s20  ;;  %15 = sbr.rel (!%p13_p5) target bundleno = 4 (0x4), region = 72 }
 0x18f   :  { %695 = vsyncpa [#allocation3], 1 }
 0x190   :  { %697 = vsyncpa [#allocation3 + $0x1], 1 }

</bundles_post_ra>
